<compile_context>
chip_gen: v5e
topology: v5e:2x2
jax: 0.10.0
libtpu: 0.0.40
codegen_flags: <defaults>
</compile_context>

<pallas_src>
import jax
import jax.numpy as jnp
from jax.experimental import pallas as pl
from jax.experimental.pallas import tpu as pltpu

# --- problem sizes (small, consistent with the module) ---
BATCH = 2
SEQ = 8
DIM = 32
HEADS = 4
DIM_HEAD = 8
MLP_DIM = 64
INNER = HEADS * DIM_HEAD          # 32
TOKENS = BATCH * SEQ              # 16  (batch folded into the row axis)
PACKED = HEADS * TOKENS           # 64  (head-packed rows: (h, b, n))
EPS = 1e-5                        # nn.LayerNorm default
LANES = 128

# --- constant-slab row offsets (single lane-dense f32 (SLAB_ROWS, 128)) ---
ROW_WQKV = 0                      # (DIM, 3*INNER)   = (32, 96)
ROW_WO = ROW_WQKV + DIM           # (INNER, DIM)     = (32, 32)
ROW_W1 = ROW_WO + INNER           # (DIM, MLP_DIM)   = (32, 64)
ROW_W2 = ROW_W1 + DIM             # (MLP_DIM, DIM)   = (64, 32)
ROW_BIAS = ROW_W2 + MLP_DIM       # (PACKED, PACKED) = (64, 64)
ROW_VEC = ROW_BIAS + PACKED       # (8, 128) packed small vectors
SLAB_ROWS = ROW_VEC + 8           # 232


def _layernorm(x, gamma, beta):
    mean = jnp.mean(x, axis=-1, keepdims=True)
    var = jnp.mean((x - mean) ** 2, axis=-1, keepdims=True)
    return (x - mean) * jax.lax.rsqrt(var + EPS) * gamma + beta


def _erf_approx(z):
    # Abramowitz & Stegun 7.1.26 rational approximation (|err| < 1.5e-7),
    # built only from ops guaranteed to lower in Mosaic (abs/where/exp/mul/div).
    a1, a2, a3, a4, a5 = (0.254829592, -0.284496736, 1.421413741,
                          -1.453152027, 1.061405429)
    p = 0.3275911
    az = jnp.abs(z)
    t = 1.0 / (1.0 + p * az)
    poly = ((((a5 * t + a4) * t + a3) * t + a2) * t + a1) * t
    y = 1.0 - poly * jnp.exp(-az * az)
    return jnp.where(z >= 0.0, y, -y)


def _gelu_exact(x):
    # nn.GELU() default is the exact-erf formulation; erf is evaluated with a
    # <1.5e-7-accurate rational approximation (well inside the test tolerance).
    return 0.5 * x * (1.0 + _erf_approx(x * 0.7071067811865476))


def transformer_kernel(x_ref,      # (TOKENS, DIM)
                       c_ref,      # (SLAB_ROWS, 128) packed constants
                       o_ref):     # (TOKENS, DIM)
    x = x_ref[...]                                     # (16, 32)

    vec = c_ref[ROW_VEC:ROW_VEC + 8, :]                # (8, 128)
    g1, b1, bo = vec[0:1, :DIM], vec[1:2, :DIM], vec[2:3, :DIM]
    g2, b2 = vec[3:4, :DIM], vec[4:5, :DIM]
    bf1, bf2 = vec[5:6, :MLP_DIM], vec[6:7, :DIM]

    # ---------- PreNorm + Attention ----------
    ln1 = _layernorm(x, g1, b1)

    # Single wide QKV projection (softmax scale pre-folded into the Q columns).
    wqkv = c_ref[ROW_WQKV:ROW_WQKV + DIM, 0:3 * INNER]            # (32, 96)
    qkv = jnp.dot(ln1, wqkv, preferred_element_type=jnp.float32)  # (16, 96)

    def pack(base):
        # heads -> sublane axis; rows ordered (head, batch, seq) -> (64, 8)
        return jnp.concatenate(
            [qkv[:, base + DIM_HEAD * h: base + DIM_HEAD * (h + 1)]
             for h in range(HEADS)], axis=0)

    qp = pack(0)
    kp = pack(INNER)
    vp = pack(2 * INNER)

    # One scores matmul for all heads & batch elements; block-diagonal
    # additive bias (0 / -1e30) is precomputed in the constant slab.
    s = jax.lax.dot_general(qp, kp, (((1,), (1,)), ((), ())),
                            preferred_element_type=jnp.float32)   # (64, 64)
    s = s + c_ref[ROW_BIAS:ROW_BIAS + PACKED, 0:PACKED]

    s = s - jnp.max(s, axis=-1, keepdims=True)
    p = jnp.exp(s)                                     # masked entries -> 0.0
    p = p / jnp.sum(p, axis=-1, keepdims=True)         # exact divide
    ctx = jnp.dot(p, vp, preferred_element_type=jnp.float32)      # (64, 8)

    # heads back onto lanes -> (16, 32), then ONE output-projection matmul.
    ctx_cat = jnp.concatenate(
        [ctx[h * TOKENS:(h + 1) * TOKENS, :] for h in range(HEADS)], axis=1)
    wo = c_ref[ROW_WO:ROW_WO + INNER, 0:DIM]                       # (32, 32)
    attn = jnp.dot(ctx_cat, wo, preferred_element_type=jnp.float32)
    res1 = attn + bo + x

    # ---------- PreNorm + PositionwiseFeedForward ----------
    ln2 = _layernorm(res1, g2, b2)
    w1 = c_ref[ROW_W1:ROW_W1 + DIM, 0:MLP_DIM]                     # (32, 64)
    hdn = jnp.dot(ln2, w1, preferred_element_type=jnp.float32) + bf1
    hdn = _gelu_exact(hdn)
    w2 = c_ref[ROW_W2:ROW_W2 + MLP_DIM, 0:DIM]                     # (64, 32)
    out = jnp.dot(hdn, w2, preferred_element_type=jnp.float32) + bf2
    o_ref[...] = out + res1


def prepare_constants(params):
    """Re-layout PyTorch-style parameters into ONE lane-dense constant slab.

    Runs once (weights are static); nothing here is on the per-call path.
    """
    (ln1_w, ln1_b, wqkv, wo, bo, ln2_w, ln2_b,
     fc1_w, fc1_b, fc2_w, fc2_b) = params

    scale = 1.0 / (DIM_HEAD ** 0.5)
    w_qkv = wqkv.T.astype(jnp.float32)                 # (32, 96), cols [q|k|v]
    w_qkv = w_qkv.at[:, :INNER].multiply(scale)        # fold softmax scale
    w_o = wo.T.astype(jnp.float32)                     # (32, 32)
    w1 = fc1_w.T.astype(jnp.float32)                   # (32, 64)
    w2 = fc2_w.T.astype(jnp.float32)                   # (64, 32)

    # Block-diagonal additive bias: rows/cols ordered (head, batch, seq);
    # same (head, batch) block  <=>  row//SEQ == col//SEQ.
    idx = jnp.arange(PACKED)
    bias = jnp.where((idx[:, None] // SEQ) == (idx[None, :] // SEQ),
                     0.0, -1e30).astype(jnp.float32)   # (64, 64)

    def row(v):
        return jnp.pad(v.astype(jnp.float32), (0, LANES - v.shape[0]))

    vec = jnp.stack([row(ln1_w), row(ln1_b), row(bo), row(ln2_w), row(ln2_b),
                     row(fc1_b), row(fc2_b),
                     jnp.zeros((LANES,), jnp.float32)], axis=0)    # (8, 128)

    def pad_lanes(a):
        return jnp.pad(a, ((0, 0), (0, LANES - a.shape[1])))

    slab = jnp.concatenate(
        [pad_lanes(w_qkv), pad_lanes(w_o), pad_lanes(w1), pad_lanes(w2),
         pad_lanes(bias), vec], axis=0)                # (232, 128)
    assert slab.shape == (SLAB_ROWS, LANES)
    return slab


@jax.jit
def transformer_pallas(x, slab):
    B, N, D = x.shape
    x2d = x.reshape(B * N, D)
    # grid=(): single invocation. At 16 tokens, a parallel grid axis (second
    # v7x TensorCore) would cost more than the work; add one only at scale.
    out2d = pl.pallas_call(
        transformer_kernel,
        out_shape=jax.ShapeDtypeStruct((B * N, D), jnp.float32),
        in_specs=[pl.BlockSpec(memory_space=pltpu.MemorySpace.VMEM),
                  pl.BlockSpec(memory_space=pltpu.MemorySpace.VMEM)],
        out_specs=pl.BlockSpec(memory_space=pltpu.MemorySpace.VMEM),
    )(x2d, slab)
    return out2d.reshape(B, N, D)


def transformer_reference(x, params):
    (ln1_w, ln1_b, wqkv, wo, bo, ln2_w, ln2_b,
     fc1_w, fc1_b, fc2_w, fc2_b) = params

    def ln(t, g, b):
        m = jnp.mean(t, axis=-1, keepdims=True)
        v = jnp.mean((t - m) ** 2, axis=-1, keepdims=True)
        return (t - m) * jax.lax.rsqrt(v + EPS) * g + b

    B, N, _ = x.shape
    l1 = ln(x, ln1_w, ln1_b)
    qkv = l1 @ wqkv.T
    q, k, v = jnp.split(qkv, 3, axis=-1)

    def to_heads(t):                                   # b n (h d) -> b h n d
        return t.reshape(B, N, HEADS, DIM_HEAD).transpose(0, 2, 1, 3)

    q, k, v = map(to_heads, (q, k, v))
    s = jnp.einsum("bhnd,bhmd->bhnm", q, k) / (DIM_HEAD ** 0.5)
    p = jax.nn.softmax(s, axis=-1)
    a = jnp.einsum("bhnm,bhmd->bhnd", p, v)
    a = a.transpose(0, 2, 1, 3).reshape(B, N, INNER)
    res1 = a @ wo.T + bo + x

    l2 = ln(res1, ln2_w, ln2_b)
    h = jax.nn.gelu(l2 @ fc1_w.T + fc1_b, approximate=False)
    return h @ fc2_w.T + fc2_b + res1


def make_params(key):
    ks = jax.random.split(key, 11)
    f32 = jnp.float32
    ln1_w = 1.0 + 0.1 * jax.random.normal(ks[0], (DIM,), f32)
    ln1_b = 0.1 * jax.random.normal(ks[1], (DIM,), f32)
    wqkv = 0.05 * jax.random.normal(ks[2], (3 * INNER, DIM), f32)   # to_qkv.weight
    wo = 0.05 * jax.random.normal(ks[3], (DIM, INNER), f32)         # final_linear.weight
    bo = 0.05 * jax.random.normal(ks[4], (DIM,), f32)
    ln2_w = 1.0 + 0.1 * jax.random.normal(ks[5], (DIM,), f32)
    ln2_b = 0.1 * jax.random.normal(ks[6], (DIM,), f32)
    fc1_w = 0.05 * jax.random.normal(ks[7], (MLP_DIM, DIM), f32)
    fc1_b = 0.05 * jax.random.normal(ks[8], (MLP_DIM,), f32)
    fc2_w = 0.05 * jax.random.normal(ks[9], (DIM, MLP_DIM), f32)
    fc2_b = 0.05 * jax.random.normal(ks[10], (DIM,), f32)
    return (ln1_w, ln1_b, wqkv, wo, bo, ln2_w, ln2_b,
            fc1_w, fc1_b, fc2_w, fc2_b)


if __name__ == "__main__":
    key = jax.random.PRNGKey(0)
    kx, kp = jax.random.split(key)
    x = jax.random.normal(kx, (BATCH, SEQ, DIM), jnp.float32)
    params = make_params(kp)

    # One-time constant packing (hoisted off the per-call path).
    slab = jax.block_until_ready(prepare_constants(params))

    out = jax.block_until_ready(transformer_pallas(x, slab))
    ref = transformer_reference(x, params)

    assert out.shape == ref.shape
    max_err = float(jnp.max(jnp.abs(out - ref)))
    assert jnp.allclose(out, ref, atol=1e-4, rtol=1e-4), max_err
    print("KERNEL_OK")
</pallas_src>

<mosaic_0001>
module attributes {stable_mosaic.version = 11 : i64} {
  func.func @transformer_kernel(%arg0: memref<16x32xf32, #tpu.memory_space<vmem>>, %arg1: memref<232x128xf32, #tpu.memory_space<vmem>>, %arg2: memref<16x32xf32, #tpu.memory_space<vmem>>) attributes {dimension_semantics = [], scalar_prefetch = 0 : i64, scratch_operands = 0 : i64, tpu.core_type = #tpu.core_type<tc>} {
    %c0 = arith.constant 0 : index
    %c0_0 = arith.constant 0 : index
    %0 = vector.load %arg0[%c0, %c0_0] : memref<16x32xf32, #tpu.memory_space<vmem>>, vector<16x32xf32>
    %c224 = arith.constant 224 : index
    %c0_1 = arith.constant 0 : index
    %1 = vector.load %arg1[%c224, %c0_1] : memref<232x128xf32, #tpu.memory_space<vmem>>, vector<8x128xf32>
    %2 = vector.extract_strided_slice %1 {offsets = [0, 0], sizes = [1, 32], strides = [1, 1]} : vector<8x128xf32> to vector<1x32xf32>
    %3 = vector.extract_strided_slice %1 {offsets = [1, 0], sizes = [1, 32], strides = [1, 1]} : vector<8x128xf32> to vector<1x32xf32>
    %4 = vector.extract_strided_slice %1 {offsets = [2, 0], sizes = [1, 32], strides = [1, 1]} : vector<8x128xf32> to vector<1x32xf32>
    %5 = vector.extract_strided_slice %1 {offsets = [3, 0], sizes = [1, 32], strides = [1, 1]} : vector<8x128xf32> to vector<1x32xf32>
    %6 = vector.extract_strided_slice %1 {offsets = [4, 0], sizes = [1, 32], strides = [1, 1]} : vector<8x128xf32> to vector<1x32xf32>
    %7 = vector.extract_strided_slice %1 {offsets = [5, 0], sizes = [1, 64], strides = [1, 1]} : vector<8x128xf32> to vector<1x64xf32>
    %8 = vector.extract_strided_slice %1 {offsets = [6, 0], sizes = [1, 32], strides = [1, 1]} : vector<8x128xf32> to vector<1x32xf32>
    %cst = arith.constant dense<0.000000e+00> : vector<16xf32>
    %9 = vector.multi_reduction <add>, %0, %cst [1] : vector<16x32xf32> to vector<16xf32>
    %10 = vector.shape_cast %9 : vector<16xf32> to vector<16x1xf32>
    %cst_2 = arith.constant 3.200000e+01 : f32
    %11 = vector.broadcast %cst_2 : f32 to vector<16x1xf32>
    %12 = arith.divf %10, %11 : vector<16x1xf32>
    %13 = vector.broadcast %12 : vector<16x1xf32> to vector<16x32xf32>
    %14 = arith.subf %0, %13 : vector<16x32xf32>
    %15 = arith.mulf %14, %14 : vector<16x32xf32>
    %cst_3 = arith.constant dense<0.000000e+00> : vector<16xf32>
    %16 = vector.multi_reduction <add>, %15, %cst_3 [1] : vector<16x32xf32> to vector<16xf32>
    %17 = vector.shape_cast %16 : vector<16xf32> to vector<16x1xf32>
    %cst_4 = arith.constant 3.200000e+01 : f32
    %18 = vector.broadcast %cst_4 : f32 to vector<16x1xf32>
    %19 = arith.divf %17, %18 : vector<16x1xf32>
    %20 = vector.broadcast %12 : vector<16x1xf32> to vector<16x32xf32>
    %21 = arith.subf %0, %20 : vector<16x32xf32>
    %cst_5 = arith.constant 9.99999974E-6 : f32
    %22 = vector.broadcast %cst_5 : f32 to vector<16x1xf32>
    %23 = arith.addf %19, %22 : vector<16x1xf32>
    %24 = math.rsqrt %23 : vector<16x1xf32>
    %25 = vector.broadcast %24 : vector<16x1xf32> to vector<16x32xf32>
    %26 = arith.mulf %21, %25 : vector<16x32xf32>
    %27 = vector.broadcast %2 : vector<1x32xf32> to vector<16x32xf32>
    %28 = arith.mulf %26, %27 : vector<16x32xf32>
    %29 = vector.broadcast %3 : vector<1x32xf32> to vector<16x32xf32>
    %30 = arith.addf %28, %29 : vector<16x32xf32>
    %c0_6 = arith.constant 0 : index
    %c0_7 = arith.constant 0 : index
    %31 = vector.load %arg1[%c0_6, %c0_7] : memref<232x128xf32, #tpu.memory_space<vmem>>, vector<32x96xf32>
    %cst_8 = arith.constant dense<0.000000e+00> : vector<16x96xf32>
    %32 = tpu.matmul %30, %31, %cst_8 {dimension_numbers = #tpu.dot_dimension_numbers<[1], [0], [0], [1], [0, 0, 1, 1], [], []>} : vector<16x32xf32>, vector<32x96xf32>, vector<16x96xf32> -> vector<16x96xf32>
    %33 = vector.extract_strided_slice %32 {offsets = [0, 0], sizes = [16, 8], strides = [1, 1]} : vector<16x96xf32> to vector<16x8xf32>
    %34 = vector.extract_strided_slice %32 {offsets = [0, 8], sizes = [16, 8], strides = [1, 1]} : vector<16x96xf32> to vector<16x8xf32>
    %35 = vector.extract_strided_slice %32 {offsets = [0, 16], sizes = [16, 8], strides = [1, 1]} : vector<16x96xf32> to vector<16x8xf32>
    %36 = vector.extract_strided_slice %32 {offsets = [0, 24], sizes = [16, 8], strides = [1, 1]} : vector<16x96xf32> to vector<16x8xf32>
    %37 = tpu.concatenate %33, %34, %35, %36 in 0 : vector<16x8xf32>, vector<16x8xf32>, vector<16x8xf32>, vector<16x8xf32> -> vector<64x8xf32>
    %38 = vector.extract_strided_slice %32 {offsets = [0, 32], sizes = [16, 8], strides = [1, 1]} : vector<16x96xf32> to vector<16x8xf32>
    %39 = vector.extract_strided_slice %32 {offsets = [0, 40], sizes = [16, 8], strides = [1, 1]} : vector<16x96xf32> to vector<16x8xf32>
    %40 = vector.extract_strided_slice %32 {offsets = [0, 48], sizes = [16, 8], strides = [1, 1]} : vector<16x96xf32> to vector<16x8xf32>
    %41 = vector.extract_strided_slice %32 {offsets = [0, 56], sizes = [16, 8], strides = [1, 1]} : vector<16x96xf32> to vector<16x8xf32>
    %42 = tpu.concatenate %38, %39, %40, %41 in 0 : vector<16x8xf32>, vector<16x8xf32>, vector<16x8xf32>, vector<16x8xf32> -> vector<64x8xf32>
    %43 = vector.extract_strided_slice %32 {offsets = [0, 64], sizes = [16, 8], strides = [1, 1]} : vector<16x96xf32> to vector<16x8xf32>
    %44 = vector.extract_strided_slice %32 {offsets = [0, 72], sizes = [16, 8], strides = [1, 1]} : vector<16x96xf32> to vector<16x8xf32>
    %45 = vector.extract_strided_slice %32 {offsets = [0, 80], sizes = [16, 8], strides = [1, 1]} : vector<16x96xf32> to vector<16x8xf32>
    %46 = vector.extract_strided_slice %32 {offsets = [0, 88], sizes = [16, 8], strides = [1, 1]} : vector<16x96xf32> to vector<16x8xf32>
    %47 = tpu.concatenate %43, %44, %45, %46 in 0 : vector<16x8xf32>, vector<16x8xf32>, vector<16x8xf32>, vector<16x8xf32> -> vector<64x8xf32>
    %cst_9 = arith.constant dense<0.000000e+00> : vector<64x64xf32>
    %48 = tpu.matmul %37, %42, %cst_9 {dimension_numbers = #tpu.dot_dimension_numbers<[1], [1], [0], [0], [0, 0, 1, 0], [], []>} : vector<64x8xf32>, vector<64x8xf32>, vector<64x64xf32> -> vector<64x64xf32>
    %c160 = arith.constant 160 : index
    %c0_10 = arith.constant 0 : index
    %49 = vector.load %arg1[%c160, %c0_10] : memref<232x128xf32, #tpu.memory_space<vmem>>, vector<64x64xf32>
    %50 = arith.addf %48, %49 : vector<64x64xf32>
    %cst_11 = arith.constant dense<0xFF800000> : vector<64xf32>
    %51 = vector.multi_reduction <maximumf>, %50, %cst_11 [1] : vector<64x64xf32> to vector<64xf32>
    %52 = vector.shape_cast %51 : vector<64xf32> to vector<64x1xf32>
    %53 = vector.broadcast %52 : vector<64x1xf32> to vector<64x64xf32>
    %54 = arith.subf %50, %53 : vector<64x64xf32>
    %55 = math.exp %54 : vector<64x64xf32>
    %cst_12 = arith.constant dense<0.000000e+00> : vector<64xf32>
    %56 = vector.multi_reduction <add>, %55, %cst_12 [1] : vector<64x64xf32> to vector<64xf32>
    %57 = vector.shape_cast %56 : vector<64xf32> to vector<64x1xf32>
    %58 = vector.broadcast %57 : vector<64x1xf32> to vector<64x64xf32>
    %59 = arith.divf %55, %58 : vector<64x64xf32>
    %cst_13 = arith.constant dense<0.000000e+00> : vector<64x8xf32>
    %60 = tpu.matmul %59, %47, %cst_13 {dimension_numbers = #tpu.dot_dimension_numbers<[1], [0], [0], [1], [0, 0, 1, 1], [], []>} : vector<64x64xf32>, vector<64x8xf32>, vector<64x8xf32> -> vector<64x8xf32>
    %61 = vector.extract_strided_slice %60 {offsets = [0, 0], sizes = [16, 8], strides = [1, 1]} : vector<64x8xf32> to vector<16x8xf32>
    %62 = vector.extract_strided_slice %60 {offsets = [16, 0], sizes = [16, 8], strides = [1, 1]} : vector<64x8xf32> to vector<16x8xf32>
    %63 = vector.extract_strided_slice %60 {offsets = [32, 0], sizes = [16, 8], strides = [1, 1]} : vector<64x8xf32> to vector<16x8xf32>
    %64 = vector.extract_strided_slice %60 {offsets = [48, 0], sizes = [16, 8], strides = [1, 1]} : vector<64x8xf32> to vector<16x8xf32>
    %65 = tpu.concatenate %61, %62, %63, %64 in 1 : vector<16x8xf32>, vector<16x8xf32>, vector<16x8xf32>, vector<16x8xf32> -> vector<16x32xf32>
    %c32 = arith.constant 32 : index
    %c0_14 = arith.constant 0 : index
    %66 = vector.load %arg1[%c32, %c0_14] : memref<232x128xf32, #tpu.memory_space<vmem>>, vector<32x32xf32>
    %cst_15 = arith.constant dense<0.000000e+00> : vector<16x32xf32>
    %67 = tpu.matmul %65, %66, %cst_15 {dimension_numbers = #tpu.dot_dimension_numbers<[1], [0], [0], [1], [0, 0, 1, 1], [], []>} : vector<16x32xf32>, vector<32x32xf32>, vector<16x32xf32> -> vector<16x32xf32>
    %68 = vector.broadcast %4 : vector<1x32xf32> to vector<16x32xf32>
    %69 = arith.addf %67, %68 : vector<16x32xf32>
    %70 = arith.addf %69, %0 : vector<16x32xf32>
    %cst_16 = arith.constant dense<0.000000e+00> : vector<16xf32>
    %71 = vector.multi_reduction <add>, %70, %cst_16 [1] : vector<16x32xf32> to vector<16xf32>
    %72 = vector.shape_cast %71 : vector<16xf32> to vector<16x1xf32>
    %cst_17 = arith.constant 3.200000e+01 : f32
    %73 = vector.broadcast %cst_17 : f32 to vector<16x1xf32>
    %74 = arith.divf %72, %73 : vector<16x1xf32>
    %75 = vector.broadcast %74 : vector<16x1xf32> to vector<16x32xf32>
    %76 = arith.subf %70, %75 : vector<16x32xf32>
    %77 = arith.mulf %76, %76 : vector<16x32xf32>
    %cst_18 = arith.constant dense<0.000000e+00> : vector<16xf32>
    %78 = vector.multi_reduction <add>, %77, %cst_18 [1] : vector<16x32xf32> to vector<16xf32>
    %79 = vector.shape_cast %78 : vector<16xf32> to vector<16x1xf32>
    %cst_19 = arith.constant 3.200000e+01 : f32
    %80 = vector.broadcast %cst_19 : f32 to vector<16x1xf32>
    %81 = arith.divf %79, %80 : vector<16x1xf32>
    %82 = vector.broadcast %74 : vector<16x1xf32> to vector<16x32xf32>
    %83 = arith.subf %70, %82 : vector<16x32xf32>
    %cst_20 = arith.constant 9.99999974E-6 : f32
    %84 = vector.broadcast %cst_20 : f32 to vector<16x1xf32>
    %85 = arith.addf %81, %84 : vector<16x1xf32>
    %86 = math.rsqrt %85 : vector<16x1xf32>
    %87 = vector.broadcast %86 : vector<16x1xf32> to vector<16x32xf32>
    %88 = arith.mulf %83, %87 : vector<16x32xf32>
    %89 = vector.broadcast %5 : vector<1x32xf32> to vector<16x32xf32>
    %90 = arith.mulf %88, %89 : vector<16x32xf32>
    %91 = vector.broadcast %6 : vector<1x32xf32> to vector<16x32xf32>
    %92 = arith.addf %90, %91 : vector<16x32xf32>
    %c64 = arith.constant 64 : index
    %c0_21 = arith.constant 0 : index
    %93 = vector.load %arg1[%c64, %c0_21] : memref<232x128xf32, #tpu.memory_space<vmem>>, vector<32x64xf32>
    %cst_22 = arith.constant dense<0.000000e+00> : vector<16x64xf32>
    %94 = tpu.matmul %92, %93, %cst_22 {dimension_numbers = #tpu.dot_dimension_numbers<[1], [0], [0], [1], [0, 0, 1, 1], [], []>} : vector<16x32xf32>, vector<32x64xf32>, vector<16x64xf32> -> vector<16x64xf32>
    %95 = vector.broadcast %7 : vector<1x64xf32> to vector<16x64xf32>
    %96 = arith.addf %94, %95 : vector<16x64xf32>
    %cst_23 = arith.constant 5.000000e-01 : f32
    %97 = vector.broadcast %cst_23 : f32 to vector<16x64xf32>
    %98 = arith.mulf %97, %96 : vector<16x64xf32>
    %cst_24 = arith.constant 0.707106769 : f32
    %99 = vector.broadcast %cst_24 : f32 to vector<16x64xf32>
    %100 = arith.mulf %96, %99 : vector<16x64xf32>
    %101 = math.absf %100 : vector<16x64xf32>
    %cst_25 = arith.constant 0.327591091 : f32
    %102 = vector.broadcast %cst_25 : f32 to vector<16x64xf32>
    %103 = arith.mulf %102, %101 : vector<16x64xf32>
    %cst_26 = arith.constant 1.000000e+00 : f32
    %104 = vector.broadcast %cst_26 : f32 to vector<16x64xf32>
    %105 = arith.addf %104, %103 : vector<16x64xf32>
    %cst_27 = arith.constant 1.000000e+00 : f32
    %106 = vector.broadcast %cst_27 : f32 to vector<16x64xf32>
    %107 = arith.divf %106, %105 : vector<16x64xf32>
    %cst_28 = arith.constant 1.06140542 : f32
    %108 = vector.broadcast %cst_28 : f32 to vector<16x64xf32>
    %109 = arith.mulf %108, %107 : vector<16x64xf32>
    %cst_29 = arith.constant -1.45315206 : f32
    %110 = vector.broadcast %cst_29 : f32 to vector<16x64xf32>
    %111 = arith.addf %109, %110 : vector<16x64xf32>
    %112 = arith.mulf %111, %107 : vector<16x64xf32>
    %cst_30 = arith.constant 1.42141378 : f32
    %113 = vector.broadcast %cst_30 : f32 to vector<16x64xf32>
    %114 = arith.addf %112, %113 : vector<16x64xf32>
    %115 = arith.mulf %114, %107 : vector<16x64xf32>
    %cst_31 = arith.constant -0.284496725 : f32
    %116 = vector.broadcast %cst_31 : f32 to vector<16x64xf32>
    %117 = arith.addf %115, %116 : vector<16x64xf32>
    %118 = arith.mulf %117, %107 : vector<16x64xf32>
    %cst_32 = arith.constant 0.254829586 : f32
    %119 = vector.broadcast %cst_32 : f32 to vector<16x64xf32>
    %120 = arith.addf %118, %119 : vector<16x64xf32>
    %121 = arith.mulf %120, %107 : vector<16x64xf32>
    %cst_33 = arith.constant 0.000000e+00 : f32
    %122 = vector.broadcast %cst_33 : f32 to vector<16x64xf32>
    %123 = arith.subf %122, %101 : vector<16x64xf32>
    %124 = arith.mulf %123, %101 : vector<16x64xf32>
    %125 = math.exp %124 : vector<16x64xf32>
    %126 = arith.mulf %121, %125 : vector<16x64xf32>
    %cst_34 = arith.constant 1.000000e+00 : f32
    %127 = vector.broadcast %cst_34 : f32 to vector<16x64xf32>
    %128 = arith.subf %127, %126 : vector<16x64xf32>
    %cst_35 = arith.constant 0.000000e+00 : f32
    %129 = vector.broadcast %cst_35 : f32 to vector<16x64xf32>
    %130 = arith.cmpf oge, %100, %129 : vector<16x64xf32>
    %cst_36 = arith.constant 0.000000e+00 : f32
    %131 = vector.broadcast %cst_36 : f32 to vector<16x64xf32>
    %132 = arith.subf %131, %128 : vector<16x64xf32>
    %133 = arith.select %130, %128, %132 : vector<16x64xi1>, vector<16x64xf32>
    %cst_37 = arith.constant 1.000000e+00 : f32
    %134 = vector.broadcast %cst_37 : f32 to vector<16x64xf32>
    %135 = arith.addf %134, %133 : vector<16x64xf32>
    %136 = arith.mulf %98, %135 : vector<16x64xf32>
    %c96 = arith.constant 96 : index
    %c0_38 = arith.constant 0 : index
    %137 = vector.load %arg1[%c96, %c0_38] : memref<232x128xf32, #tpu.memory_space<vmem>>, vector<64x32xf32>
    %cst_39 = arith.constant dense<0.000000e+00> : vector<16x32xf32>
    %138 = tpu.matmul %136, %137, %cst_39 {dimension_numbers = #tpu.dot_dimension_numbers<[1], [0], [0], [1], [0, 0, 1, 1], [], []>} : vector<16x64xf32>, vector<64x32xf32>, vector<16x32xf32> -> vector<16x32xf32>
    %139 = vector.broadcast %8 : vector<1x32xf32> to vector<16x32xf32>
    %140 = arith.addf %138, %139 : vector<16x32xf32>
    %141 = arith.addf %140, %70 : vector<16x32xf32>
    %c0_40 = arith.constant 0 : index
    %c0_41 = arith.constant 0 : index
    %142 = vector.load %arg2[%c0_40, %c0_41] : memref<16x32xf32, #tpu.memory_space<vmem>>, vector<16x32xf32>
    tpu.vector_store %arg2[%c0_40, %c0_41], %141 {strides = array<i32>} : memref<16x32xf32, #tpu.memory_space<vmem>>, vector<16x32xf32>,
    return
  }
}

</mosaic_0001>

<bundles_post_ra>
// kernel: transformer_pallas.1
= control target key start
LH: loop header
LB: loop body
LE: loop exit
PB: predicated region body
PF: predicated region fallthrough
CT: control target
= control target key end

     0   :  { %7 = vsyncpa [#allocation3], 0  ;;  %s1310_s0 = inlined_call_operand.hbm [shape: f32[16,32], index: 0, kind: input, shape index: {}]   ;;  %s1311_s1 = inlined_call_operand.hbm [shape: f32[232,128], index: 1, kind: input, shape index: {}]   ;;  %s1312_s2 = inlined_call_operand.hbm [shape: f32[16,32], index: 2, kind: output, shape index: {}]  }
   0x1   :  { %8 = vsyncpa [#allocation6], 0 }
   0x2   :  { %9 = vsyncpa [#allocation4], 0  ;;  %s14_s11 = sshll.u32 %s1310_s0, 4  ;;  %s1036_s12 = smov [#allocation2]   ;;  %s15_s11 = int_to_ptr.hbm [resolvable:$true] %s14_s11 }
   0x3   :  { %s16_s13 = sshll.u32 %s1036_s12, 4  ;;  %s27_s16 = sshll.u32 %s1311_s1, 4  ;;  %s17_s13 = int_to_ptr.vmem [resolvable:$true] %s16_s13  ;;  %s28_s16 = int_to_ptr.hbm [resolvable:$true] %s27_s16 }
   0x4   :  { %s1037_s17 = smov 128   ;;  %s1038_s18 = smov 8  }
   0x5   :  { %22 = dma.hbm_to_vmem [thread:$0]  %s15_s11, 256, %s17_s13, [#allocation3], %s1037_s17, %s1037_s17, %s1038_s18  }
   0x6   :  { %s1039_s19 = smov [#allocation5]  }
   0x7   :  { %s29_s20 = sshll.u32 %s1039_s19, 4  ;;  %s30_s20 = int_to_ptr.vmem [resolvable:$true] %s29_s20 }
   0x8   :  { %35 = dma.hbm_to_vmem [thread:$0]  %s28_s16, 3712, %s30_s20, [#allocation6], %s1037_s17, %s1037_s17, %s1038_s18  }
   0x9   :  { %1030 = dma.done.wait [#allocation3], 256  }
   0xa   :  { %1031 = vsyncadd [#allocation3], 4294967040 }
   0xb   :  { %1032 = dma.done.wait [#allocation6], 3712  }
   0xc   :  { %1033 = vsyncadd [#allocation6], 4294963584  ;;  %vm47_vm0 = vcmask 261120   ;;  %v1076_v0 = vld [vmem:[#allocation2] sm:$0xff]  ;;  %v1080_v2 = vld [vmem:[#allocation2 + $0x8] sm:$0xff]  ;;  %v1040_v4 = vmov 32.0  }
   0xd   :  { %v48_v1 = vsel %vm47_vm0, %v1076_v0, 0.0  ;;  %v51_v3 = vsel %vm47_vm0, %v1080_v2, 0.0  ;;  %907 = vrcp.f32 %v1040_v4  ;;  %v108_v21 = vld [vmem:[#allocation5 + $0x18] sm:$0xff]  ;;  %v107_v22 = vld [vmem:[#allocation5 + $0x10] sm:$0xff]  ;;  %v106_v23 = vld [vmem:[#allocation5 + $0x8] sm:$0xff]  ;;  %s1041_s0 = smov 112  }
   0xe   :  { %49 = vadd.xlane.f32.xlu0 %v48_v1  ;;  %127 = vmatpush.msra.mxu0 %v108_v21  ;;  %v105_v24 = vld [vmem:[#allocation5] sm:$0xff]  ;;  %s1042_s1 = smov 104   ;;  %s1043_s21 = smov 120   ;;  %vm176_vm8 = vcmask 64512   ;;  %vm250_vm9 = vcmask 523264  }
   0xf   :  { %v1094_v36 = vld [vmem:[#allocation5 + $0xe0] sm:$0xff]  ;;  %s1044_s22 = smov 96   ;;  %s1045_s23 = smov 64  }
  0x10   :  { %128 = vmatpush.msra.mxu0 %v107_v22  ;;  %v99_v40 = vperm.slane %v1094_v36, 0  ;;  %v102_v44 = vperm.slane %v1094_v36, 1  ;;  %v156_v22 = vld [vmem:[#allocation5 + $0xc0] sm:$0xff]  ;;  %s1046_s24 = smov 16   ;;  %s1047_s25 = smov 24  }
  0x11   :  { %s1048_s26 = smov [#allocation7]   ;;  %s812_s30 = sshll.u32 %s1312_s2, 4  ;;  %s813_s30 = int_to_ptr.hbm [resolvable:$true] %s812_s30 }
  0x12   :  { %129 = vmatpush.msra.mxu0 %v106_v23  ;;  %v154_v23 = vld [vmem:[#allocation5 + $0xb0] sm:$0xff]  ;;  %s810_s27 = sshll.u32 %s1048_s26, 4  ;;  %s811_s27 = int_to_ptr.vmem [resolvable:$true] %s810_s27 }
  0x13   :  { %v908_v5 = vpop.eup %907 }
  0x14   :  { %v55_v6 = vmul.f32 32.0, %v908_v5  ;;  %vm59_vm1 = vweird.f32 %v908_v5  ;;  %130 = vmatpush.msra.mxu0 %v105_v24 }
  0x16   :  { %52 = vadd.xlane.f32.xlu0 %v51_v3  ;;  %v56_v7 = vsub.f32 1.0, %v55_v6 }
  0x18   :  { %v57_v8 = vmul.f32 %v908_v5, %v56_v7 }
  0x1a   :  { %v58_v9 = vadd.f32 %v908_v5, %v57_v8  ;;  %v152_v8 = vld [vmem:[#allocation5 + $0xa0] sm:$0xff] }
  0x1c   :  { %v1084_v10 = vsel %vm59_vm1, %v908_v5, %v58_v9 }
  0x81   :  { %v50_v11 = vpop.xlane.xlu0 %49 }
  0x82   :  { %v61_v12 = vmul.f32 %v1084_v10, %v50_v11 }
  0x84   :  { %v63_v13 = vsub.f32 %v1076_v0, %v61_v12 }
  0x86   :  { %v65_v14 = vmul.f32 %v63_v13, %v63_v13 }
  0x88   :  { %v67_v15 = vsel %vm47_vm0, %v65_v14, 0.0  ;;  %v155_v14 = vld [vmem:[#allocation5 + $0xb8] sm:$0xff] }
  0x89   :  { %68 = vadd.xlane.f32.xlu1 %v67_v15  ;;  %v53_v16 = vpop.xlane.xlu0 %52  ;;  %v153_v15 = vld [vmem:[#allocation5 + $0xa8] sm:$0xff] }
  0x8a   :  { %v62_v17 = vmul.f32 %v1084_v10, %v53_v16 }
  0x8c   :  { %v64_v18 = vsub.f32 %v1080_v2, %v62_v17 }
  0x8e   :  { %v66_v19 = vmul.f32 %v64_v18, %v64_v18 }
  0x90   :  { %v70_v20 = vsel %vm47_vm0, %v66_v19, 0.0 }
  0x91   :  { %71 = vadd.xlane.f32.xlu1 %v70_v20 }
  0xfc   :  { %v69_v25 = vpop.xlane.xlu1 %68 }
  0xfd   :  { %v73_v26 = vmul.f32 %v69_v25, %v1084_v10 }
  0xff   :  { %v75_v27 = vadd.f32 1e-05, %v73_v26 }
 0x101   :  { %909 = vrsqrt.f32 %v75_v27  ;;  %vm83_vm3 = vweird.f32 %v75_v27 }
 0x104   :  { %v72_v28 = vpop.xlane.xlu1 %71 }
 0x105   :  { %v74_v29 = vmul.f32 %v72_v28, %v1084_v10 }
 0x107   :  { %v910_v30 = vpop.eup %909  ;;  %v76_v31 = vadd.f32 1e-05, %v74_v29 }
 0x108   :  { %v78_v32 = vmul.f32 %v910_v30, %v75_v27  ;;  %vm84_vm2 = vweird.f32 %v910_v30 }
 0x109   :  { %911 = vrsqrt.f32 %v76_v31  ;;  %vm85_vm4 = vmor %vm83_vm3, %vm84_vm2  ;;  %vm93_vm6 = vweird.f32 %v76_v31 }
 0x10a   :  { %v79_v33 = vmul.f32 %v910_v30, %v78_v32 }
 0x10c   :  { %v80_v34 = vmul.f32 0.5, %v79_v33 }
 0x10e   :  { %v81_v35 = vsub.f32 1.5, %v80_v34 }
 0x10f   :  { %v912_v37 = vpop.eup %911 }
 0x110   :  { %v82_v38 = vmul.f32 %v910_v30, %v81_v35  ;;  %v88_v39 = vmul.f32 %v912_v37, %v76_v31  ;;  %vm94_vm5 = vweird.f32 %v912_v37  ;;  %v158_v31 = vld [vmem:[#allocation5 + $0xd0] sm:$0xff] }
 0x111   :  { %vm95_vm7 = vmor %vm93_vm6, %vm94_vm5 }
 0x112   :  { %v86_v41 = vsel %vm85_vm4, %v910_v30, %v82_v38  ;;  %v89_v42 = vmul.f32 %v912_v37, %v88_v39  ;;  %v157_v30 = vld [vmem:[#allocation5 + $0xc8] sm:$0xff] }
 0x113   :  { %v97_v43 = vmul.f32 %v86_v41, %v63_v13 }
 0x114   :  { %v90_v45 = vmul.f32 0.5, %v89_v42 }
 0x115   :  { %v100_v46 = vmul.f32 %v99_v40, %v97_v43 }
 0x116   :  { %v91_v47 = vsub.f32 1.5, %v90_v45 }
 0x117   :  { %v103_v48 = vadd.f32 %v102_v44, %v100_v46 }
 0x118   :  { %v92_v49 = vmul.f32 %v912_v37, %v91_v47 }
 0x119   :  { %826 = vmatmul.msk.f32.vlgmr.msra.gmra.mxu0 %vm47_vm0, %v103_v48 }
 0x11a   :  { %v96_v50 = vsel %vm95_vm7, %v912_v37, %v92_v49 }
 0x11b   :  { %v98_v51 = vmul.f32 %v96_v50, %v64_v18 }
 0x11d   :  { %v101_v52 = vmul.f32 %v99_v40, %v98_v51  ;;  %v159_v40 = vld [vmem:[#allocation5 + $0xd8] sm:$0xff] }
 0x11f   :  { %v104_v53 = vadd.f32 %v102_v44, %v101_v52 }
 0x121   :  { %827 = vmatmul.msk.f32.gmra.mxu0 %vm47_vm0, %v104_v53 }
 0x196   :  { %v1100_v54 = vpop.f32.mrf.mxu0 }
 0x197   :  { %144 = vrot.lane.b32.xlu1 %v1100_v54, %s1041_s0 }
 0x19e   :  { %v1103_v55 = vpop.f32.mrf.mxu0 }
 0x19f   :  { %146 = vrot.lane.b32.xlu0 %v1103_v55, %s1041_s0  ;;  %150 = vrot.lane.b32.xlu2 %v1103_v55, %s1042_s1  ;;  %v902_v44 = vpack.i.bf16 %v1100_v54, %v1103_v55 }
 0x1a7   :  { %148 = vrot.lane.b32.xlu2 %v1100_v54, %s1042_s1 }
 0x1af   :  { %142 = vrot.lane.b32.xlu2 %v1103_v55, %s1043_s21 }
 0x1b7   :  { %140 = vrot.lane.b32.xlu2 %v1100_v54, %s1043_s21 }
 0x1f9   :  { %v1110_v56 = vpop.permute.xlu2 %150 }
 0x1fa   :  { %174 = vrot.lane.b32.xlu2 %v1110_v56, %s1044_s22 }
 0x201   :  { %v1113_v57 = vpop.permute.xlu2 %148 }
 0x202   :  { %172 = vrot.lane.b32.xlu0 %v1113_v57, %s1044_s22  ;;  %v887_v39 = vpack.i.bf16 %v1113_v57, %v1110_v56 }
 0x209   :  { %v1116_v58 = vpop.permute.xlu2 %142  ;;  %v1118_v59 = vpop.permute.xlu1 %144 }
 0x20a   :  { %166 = vrot.lane.b32.xlu0 %v1116_v58, %s1044_s22  ;;  %168 = vrot.lane.b32.xlu1 %v1118_v59, %s1044_s22 }
 0x211   :  { %v1122_v60 = vpop.permute.xlu0 %146  ;;  %v1127_v61 = vpop.permute.xlu2 %140 }
 0x212   :  { %170 = vrot.lane.b32.xlu2 %v1122_v60, %s1044_s22  ;;  %160 = vrot.lane.b32.xlu0 %v1100_v54, %s1044_s22  ;;  %v892_v38 = vpack.i.bf16 %v1118_v59, %v1122_v60 }
 0x213   :  { %162 = vrot.lane.b32.xlu1 %v1103_v55, %s1044_s22 }
 0x21a   :  { %164 = vrot.lane.b32.xlu2 %v1127_v61, %s1044_s22 }
 0x254   :  { %v175_v62 = vpop.permute.xlu2 %174 }
 0x255   :  { %828 = vmatpush.xpose.msk.msrb.mxu0 %vm176_vm8, %v175_v62  ;;  %858 = vmatpush.xpose.msk.msra.mxu1 %vm176_vm8, %v175_v62 }
 0x26c   :  { %v171_v1 = vpop.permute.xlu2 %170 }
 0x274   :  { %v173_v63 = vpop.permute.xlu0 %172  ;;  %v165_v5 = vpop.permute.xlu2 %164 }
 0x275   :  { %829 = vmatpush.xpose.msk.msrb.mxu0 %vm176_vm8, %v173_v63  ;;  %859 = vmatpush.xpose.msk.msra.mxu1 %vm176_vm8, %v173_v63 }
 0x279   :  { %830 = vmatpush.xpose.msk.msrb.mxu0 %vm176_vm8, %v171_v1  ;;  %860 = vmatpush.xpose.msk.msra.mxu1 %vm176_vm8, %v171_v1 }
 0x27c   :  { %v169_v3 = vpop.permute.xlu1 %168  ;;  %v167_v4 = vpop.permute.xlu0 %166 }
 0x27d   :  { %831 = vmatpush.xpose.msk.msrb.mxu0 %vm176_vm8, %v169_v3  ;;  %861 = vmatpush.xpose.msk.msra.mxu1 %vm176_vm8, %v169_v3 }
 0x281   :  { %832 = vmatpush.xpose.msk.msrb.mxu0 %vm176_vm8, %v167_v4  ;;  %862 = vmatpush.xpose.msk.msra.mxu1 %vm176_vm8, %v167_v4 }
 0x284   :  { %v161_v7 = vpop.permute.xlu0 %160 }
 0x285   :  { %833 = vmatpush.xpose.msk.msrb.mxu0 %vm176_vm8, %v165_v5  ;;  %863 = vmatpush.xpose.msk.msra.mxu1 %vm176_vm8, %v165_v5  ;;  %v163_v6 = vpop.permute.xlu1 %162 }
 0x289   :  { %834 = vmatpush.xpose.msk.msrb.mxu0 %vm176_vm8, %v163_v6  ;;  %864 = vmatpush.xpose.msk.msra.mxu1 %vm176_vm8, %v163_v6 }
 0x28d   :  { %835 = vmatpush.xpose.msk.msrb.mxu0 %vm176_vm8, %v161_v7  ;;  %865 = vmatpush.xpose.msk.msra.mxu1 %vm176_vm8, %v161_v7 }
 0x290   :  { %836 = vmatmul.msk.f32.vlgmr.msrb.gmra.mxu0 %vm176_vm8, %v1100_v54  ;;  %839 = vmatmul.msk.f32.vlgmr.msra.gmra.mxu1 %vm176_vm8, %v1116_v58 }
 0x298   :  { %837 = vmatmul.msk.f32.gmra.mxu0 %vm176_vm8, %v1103_v55  ;;  %840 = vmatmul.msk.f32.gmra.mxu1 %vm176_vm8, %v1118_v59 }
 0x2a0   :  { %838 = vmatmul.msk.f32.gmra.mxu0 %vm176_vm8, %v1127_v61  ;;  %841 = vmatmul.msk.f32.gmra.mxu1 %vm176_vm8, %v1122_v60 }
 0x2a8   :  { %842 = vmatmul.msk.f32.gmra.mxu1 %vm176_vm8, %v1113_v57 }
 0x2b0   :  { %843 = vmatmul.msk.f32.gmra.mxu1 %vm176_vm8, %v1110_v56 }
 0x30d   :  { %v226_v9 = vpop.f32.mrf.mxu0  ;;  %v235_v11 = vpop.f32.mrf.mxu1 }
 0x30e   :  { %v227_v12 = vadd.f32 %v226_v9, %v152_v8  ;;  %v236_v16 = vadd.f32 %v235_v11, %v155_v14 }
 0x310   :  { %v251_v13 = vsel %vm250_vm9, %v227_v12, -inf  ;;  %v260_v21 = vsel %vm250_vm9, %v236_v16, -inf }
 0x311   :  { %252 = vmax.xlane.f32.xlu2 %v251_v13 }
 0x315   :  { %v229_v17 = vpop.f32.mrf.mxu0  ;;  %v238_v18 = vpop.f32.mrf.mxu1 }
 0x316   :  { %v230_v19 = vadd.f32 %v229_v17, %v153_v15  ;;  %v1165_v24 = vadd.f32 %v238_v18, %v156_v22 }
 0x318   :  { %v254_v20 = vsel %vm250_vm9, %v230_v19, -inf  ;;  %v263_v29 = vsel %vm250_vm9, %v1165_v24, -inf }
 0x319   :  { %255 = vmax.xlane.f32.xlu1 %v254_v20  ;;  %261 = vmax.xlane.f32.xlu2 %v260_v21 }
 0x31d   :  { %v232_v25 = vpop.f32.mrf.mxu0  ;;  %v241_v26 = vpop.f32.mrf.mxu1 }
 0x31e   :  { %v233_v27 = vadd.f32 %v232_v25, %v154_v23  ;;  %v242_v32 = vadd.f32 %v241_v26, %v157_v30 }
 0x320   :  { %v257_v28 = vsel %vm250_vm9, %v233_v27, -inf  ;;  %v266_v35 = vsel %vm250_vm9, %v242_v32, -inf }
 0x321   :  { %258 = vmax.xlane.f32.xlu0 %v257_v28  ;;  %264 = vmax.xlane.f32.xlu1 %v263_v29 }
 0x325   :  { %v244_v33 = vpop.f32.mrf.mxu1 }
 0x326   :  { %v245_v34 = vadd.f32 %v244_v33, %v158_v31 }
 0x328   :  { %v269_v37 = vsel %vm250_vm9, %v245_v34, -inf }
 0x329   :  { %267 = vmax.xlane.f32.xlu0 %v266_v35  ;;  %270 = vmax.xlane.f32.xlu2 %v269_v37 }
 0x32d   :  { %v247_v41 = vpop.f32.mrf.mxu1 }
 0x32e   :  { %v1178_v42 = vadd.f32 %v247_v41, %v159_v40 }
 0x330   :  { %v272_v43 = vsel %vm250_vm9, %v1178_v42, -inf }
 0x33d   :  { %893 = vrot.lane.b32.xlu0 %v892_v38, %s1045_s23 }
 0x341   :  { %888 = vrot.lane.b32.xlu2 %v887_v39, %s1045_s23 }
 0x367   :  { %273 = vmax.xlane.f32.xlu0 %v272_v43 }
 0x37b   :  { %903 = vrot.lane.b32.xlu0 %v902_v44, %s1045_s23 }
 0x384   :  { %v253_v45 = vpop.xlane.xlu2 %252 }
 0x385   :  { %v275_v46 = vsub.f32 %v227_v12, %v253_v45 }
 0x387   :  { %v283_v47 = vmul.f32 1.442695, %v275_v46 }
 0x389   :  { %913 = vpow2.f32 %v283_v47 }
 0x38c   :  { %v256_v48 = vpop.xlane.xlu1 %255  ;;  %v262_v52 = vpop.xlane.xlu2 %261 }
 0x38d   :  { %v276_v49 = vsub.f32 %v230_v19, %v256_v48  ;;  %v278_v56 = vsub.f32 %v236_v16, %v262_v52  ;;  %v897_v19 = vpack.i.bf16 %v1127_v61, %v1116_v58 }
 0x38f   :  { %v1185_v50 = vpop.eup %913  ;;  %v285_v51 = vmul.f32 1.442695, %v276_v49  ;;  %v289_v59 = vmul.f32 1.442695, %v278_v56 }
 0x390   :  { %v299_v53 = vsel %vm250_vm9, %v1185_v50, 0.0 }
 0x391   :  { %915 = vpow2.f32 %v285_v51  ;;  %300 = vadd.xlane.f32.xlu1 %v299_v53 }
 0x394   :  { %v259_v57 = vpop.xlane.xlu0 %258  ;;  %v265_v23 = vpop.xlane.xlu1 %264 }
 0x395   :  { %v277_v54 = vsub.f32 %v233_v27, %v259_v57  ;;  %v279_v25 = vsub.f32 %v1165_v24, %v265_v23 }
 0x397   :  { %v1189_v55 = vpop.eup %915  ;;  %v287_v60 = vmul.f32 1.442695, %v277_v54  ;;  %v291_v26 = vmul.f32 1.442695, %v279_v25 }
 0x398   :  { %v302_v62 = vsel %vm250_vm9, %v1189_v55, 0.0 }
 0x399   :  { %917 = vpow2.f32 %v287_v60  ;;  %303 = vadd.xlane.f32.xlu1 %v302_v62 }
 0x39a   :  { %919 = vpow2.f32 %v289_v59 }
 0x39c   :  { %v268_v63 = vpop.xlane.xlu0 %267  ;;  %v271_v1 = vpop.xlane.xlu2 %270 }
 0x39d   :  { %v280_v3 = vsub.f32 %v242_v32, %v268_v63  ;;  %v281_v6 = vsub.f32 %v245_v34, %v271_v1 }
 0x39f   :  { %v1193_v4 = vpop.eup %917  ;;  %v293_v5 = vmul.f32 1.442695, %v280_v3  ;;  %v295_v9 = vmul.f32 1.442695, %v281_v6 }
 0x3a0   :  { %v305_v7 = vsel %vm250_vm9, %v1193_v4, 0.0  ;;  %v1197_v8 = vpop.eup %919 }
 0x3a1   :  { %921 = vpow2.f32 %v293_v5  ;;  %306 = vadd.xlane.f32.xlu2 %v305_v7  ;;  %v308_v12 = vsel %vm250_vm9, %v1197_v8, 0.0 }
 0x3a2   :  { %923 = vpow2.f32 %v295_v9 }
 0x3a3   :  { %925 = vpow2.f32 %v291_v26 }
 0x3a4   :  { %v889_v11 = vpop.permute.xlu2 %888 }
 0x3a5   :  { %309 = vadd.xlane.f32.xlu0 %v308_v12  ;;  %v890_v13 = vunpack.i.l.bf16 %v889_v11  ;;  %v891_v15 = vunpack.i.h.bf16 %v889_v11 }
 0x3a7   :  { %v1201_v14 = vpop.eup %921  ;;  %499 = vmatpush.msra.mxu2 %v890_v13  ;;  %866 = vmatpush.msra.mxu3 %v890_v13 }
 0x3a8   :  { %v314_v16 = vsel %vm250_vm9, %v1201_v14, 0.0  ;;  %v1205_v17 = vpop.eup %923 }
 0x3a9   :  { %315 = vadd.xlane.f32.xlu2 %v314_v16  ;;  %500 = vmatpush.msra.mxu2 %v891_v15  ;;  %v317_v20 = vsel %vm250_vm9, %v1205_v17, 0.0  ;;  %v1213_v27 = vpop.eup %925 }
 0x3aa   :  { %867 = vmatpush.msra.mxu3 %v891_v15  ;;  %v311_v28 = vsel %vm250_vm9, %v1213_v27, 0.0 }
 0x3af   :  { %v894_v18 = vpop.permute.xlu0 %893 }
 0x3b0   :  { %v895_v21 = vunpack.i.l.bf16 %v894_v18  ;;  %v896_v22 = vunpack.i.h.bf16 %v894_v18 }
 0x3b1   :  { %318 = vadd.xlane.f32.xlu2 %v317_v20 }
 0x3b2   :  { %898 = vrot.lane.b32.xlu1 %v897_v19, %s1045_s23  ;;  %501 = vmatpush.msra.mxu2 %v895_v21 }
 0x3b3   :  { %868 = vmatpush.msra.mxu3 %v895_v21 }
 0x3b4   :  { %502 = vmatpush.msra.mxu2 %v896_v22 }
 0x3b5   :  { %869 = vmatpush.msra.mxu3 %v896_v22 }
 0x3da   :  { %v274_v58 = vpop.xlane.xlu0 %273 }
 0x3db   :  { %v282_v61 = vsub.f32 %v1178_v42, %v274_v58 }
 0x3dc   :  { %312 = vadd.xlane.f32.xlu1 %v311_v28 }
 0x3dd   :  { %v297_v29 = vmul.f32 1.442695, %v282_v61 }
 0x3df   :  { %927 = vpow2.f32 %v297_v29 }
 0x3e5   :  { %v1218_v30 = vpop.eup %927 }
 0x3e6   :  { %v320_v31 = vsel %vm250_vm9, %v1218_v30, 0.0 }
 0x3e7   :  { %321 = vadd.xlane.f32.xlu0 %v320_v31 }
 0x3ed   :  { %v904_v35 = vpop.permute.xlu0 %903 }
 0x3ee   :  { %v905_v54 = vunpack.i.l.bf16 %v904_v35  ;;  %v906_v3 = vunpack.i.h.bf16 %v904_v35 }
 0x404   :  { %v301_v24 = vpop.xlane.xlu1 %300 }
 0x405   :  { %929 = vrcp.f32 %v301_v24  ;;  %v334_v46 = vand.u32 2147483648, %v301_v24  ;;  %vm328_vm11 = vweird.f32 %v301_v24  ;;  %v332_v48 = vand.u32 2147483647, %v301_v24 }
 0x407   :  { %v335_v56 = vor.u32 1.1754944e-38, %v334_v46  ;;  %vm333_vm13 = vcmp.eq.f32.partialorder %v332_v48, 8.507059e+37 }
 0x40b   :  { %v930_v33 = vpop.eup %929 }
 0x40c   :  { %v304_v32 = vpop.xlane.xlu1 %303  ;;  %v324_v34 = vmul.f32 %v930_v33, %v301_v24  ;;  %vm329_vm10 = vweird.f32 %v930_v33 }
 0x40d   :  { %931 = vrcp.f32 %v304_v32  ;;  %vm330_vm12 = vmor %vm328_vm11, %vm329_vm10  ;;  %v349_v1 = vand.u32 2147483648, %v304_v32  ;;  %vm343_vm15 = vweird.f32 %v304_v32  ;;  %v347_v6 = vand.u32 2147483647, %v304_v32 }
 0x40e   :  { %v325_v37 = vsub.f32 1.0, %v324_v34 }
 0x40f   :  { %v350_v12 = vor.u32 1.1754944e-38, %v349_v1  ;;  %vm348_vm2 = vcmp.eq.f32.partialorder %v347_v6, 8.507059e+37 }
 0x410   :  { %v326_v40 = vmul.f32 %v930_v33, %v325_v37 }
 0x412   :  { %v327_v44 = vadd.f32 %v930_v33, %v326_v40 }
 0x413   :  { %v932_v39 = vpop.eup %931 }
 0x414   :  { %v307_v38 = vpop.xlane.xlu2 %306  ;;  %v339_v41 = vmul.f32 %v932_v39, %v304_v32  ;;  %v331_v53 = vsel %vm330_vm12, %v930_v33, %v327_v44  ;;  %vm344_vm14 = vweird.f32 %v932_v39 }
 0x415   :  { %933 = vrcp.f32 %v307_v38  ;;  %v336_v59 = vsel %vm333_vm13, %v335_v56, %v331_v53  ;;  %vm345_vm1 = vmor %vm343_vm15, %vm344_vm14  ;;  %v364_v18 = vand.u32 2147483648, %v307_v38  ;;  %vm358_vm4 = vweird.f32 %v307_v38 }
 0x416   :  { %v340_v42 = vsub.f32 1.0, %v339_v41  ;;  %v337_v5 = vmul.f32 %v1185_v50, %v336_v59  ;;  %v362_v19 = vand.u32 2147483647, %v307_v38 }
 0x417   :  { %v365_v22 = vor.u32 1.1754944e-38, %v364_v18 }
 0x418   :  { %v1222_v43 = vpop.xlane.xlu0 %309  ;;  %v341_v51 = vmul.f32 %v932_v39, %v340_v42  ;;  %vm363_vm6 = vcmp.eq.f32.partialorder %v362_v19, 8.507059e+37 }
 0x419   :  { %935 = vrcp.f32 %v1222_v43  ;;  %v379_v26 = vand.u32 2147483648, %v1222_v43  ;;  %vm373_vm10 = vweird.f32 %v1222_v43  ;;  %v377_v61 = vand.u32 2147483647, %v1222_v43 }
 0x41a   :  { %v342_v62 = vadd.f32 %v932_v39, %v341_v51 }
 0x41b   :  { %v934_v45 = vpop.eup %933  ;;  %v380_v28 = vor.u32 1.1754944e-38, %v379_v26  ;;  %vm378_vm12 = vcmp.eq.f32.partialorder %v377_v61, 8.507059e+37 }
 0x41c   :  { %v354_v52 = vmul.f32 %v934_v45, %v307_v38  ;;  %v346_v11 = vsel %vm345_vm1, %v932_v39, %v342_v62  ;;  %vm359_vm3 = vweird.f32 %v934_v45  ;;  %v316_v31 = vpop.xlane.xlu2 %315 }
 0x41d   :  { %v351_v13 = vsel %vm348_vm2, %v350_v12, %v346_v11  ;;  %vm360_vm5 = vmor %vm358_vm4, %vm359_vm3  ;;  %937 = vrcp.f32 %v316_v31  ;;  %vm403_vm3 = vweird.f32 %v316_v31 }
 0x41e   :  { %v355_v60 = vsub.f32 1.0, %v354_v52  ;;  %v352_v50 = vmul.f32 %v1189_v55, %v351_v13  ;;  %v409_v52 = vand.u32 2147483648, %v316_v31 }
 0x41f   :  { %v936_v63 = vpop.eup %935 }
 0x420   :  { %v356_v7 = vmul.f32 %v934_v45, %v355_v60  ;;  %v369_v9 = vmul.f32 %v936_v63, %v1222_v43  ;;  %vm374_vm7 = vweird.f32 %v936_v63 }
 0x421   :  { %vm375_vm11 = vmor %vm373_vm10, %vm374_vm7 }
 0x422   :  { %v370_v15 = vsub.f32 1.0, %v369_v9  ;;  %v357_v16 = vadd.f32 %v934_v45, %v356_v7 }
 0x423   :  { %v938_v33 = vpop.eup %937 }
 0x424   :  { %v899_v47 = vpop.permute.xlu1 %898  ;;  %v371_v20 = vmul.f32 %v936_v63, %v370_v15  ;;  %v361_v21 = vsel %vm360_vm5, %v934_v45, %v357_v16  ;;  %v1237_v32 = vpop.xlane.xlu2 %318  ;;  %vm404_vm1 = vweird.f32 %v938_v33 }
 0x425   :  { %v900_v49 = vunpack.i.l.bf16 %v899_v47  ;;  %v901_v57 = vunpack.i.h.bf16 %v899_v47  ;;  %v366_v23 = vsel %vm363_vm6, %v365_v22, %v361_v21  ;;  %vm405_vm4 = vmor %vm403_vm3, %vm404_vm1  ;;  %v424_v11 = vand.u32 2147483648, %v1237_v32 }
 0x426   :  { %v372_v25 = vadd.f32 %v936_v63, %v371_v20  ;;  %v367_v58 = vmul.f32 %v1193_v4, %v366_v23  ;;  %v399_v4 = vmul.f32 %v938_v33, %v316_v31  ;;  %v422_v15 = vand.u32 2147483647, %v1237_v32 }
 0x427   :  { %503 = vmatpush.msra.mxu2 %v900_v49  ;;  %870 = vmatpush.msra.mxu3 %v900_v49  ;;  %v425_v19 = vor.u32 1.1754944e-38, %v424_v11  ;;  %vm558_vm1 = vcmask 130048  }
 0x428   :  { %v376_v55 = vsel %vm375_vm11, %v936_v63, %v372_v25  ;;  %v400_v37 = vsub.f32 1.0, %v399_v4  ;;  %v410_v63 = vor.u32 1.1754944e-38, %v409_v52  ;;  %vm418_vm11 = vweird.f32 %v1237_v32 }
 0x429   :  { %504 = vmatpush.msra.mxu2 %v901_v57  ;;  %871 = vmatpush.msra.mxu3 %v901_v57  ;;  %v381_v29 = vsel %vm378_vm12, %v380_v28, %v376_v55  ;;  %v566_v28 = vld [vmem:[#allocation5 + $0x30] sm:$0xff] }
 0x42a   :  { %v382_v24 = vmul.f32 %v1197_v8, %v381_v29  ;;  %v401_v41 = vmul.f32 %v938_v33, %v400_v37  ;;  %v565_v29 = vld [vmem:[#allocation5 + $0x28] sm:$0xff] }
 0x42b   :  { %505 = vmatpush.msra.mxu2 %v905_v54  ;;  %872 = vmatpush.msra.mxu3 %v905_v54  ;;  %v407_v54 = vand.u32 2147483647, %v316_v31  ;;  %v564_v31 = vld [vmem:[#allocation5 + $0x20] sm:$0xff] }
 0x42c   :  { %v402_v51 = vadd.f32 %v938_v33, %v401_v41 }
 0x42d   :  { %506 = vmatpush.msra.mxu2 %v906_v3  ;;  %873 = vmatpush.msra.mxu3 %v906_v3  ;;  %vm408_vm5 = vcmp.eq.f32.partialorder %v407_v54, 8.507059e+37 }
 0x42e   :  { %844 = vmatmul.msk.f32.vlgmr.msra.gmra.mxu2 %vm250_vm9, %v337_v5  ;;  %v406_v62 = vsel %vm405_vm4, %v938_v33, %v402_v51 }
 0x42f   :  { %v411_v6 = vsel %vm408_vm5, %v410_v63, %v406_v62  ;;  %v653_v63 = vld [vmem:[#allocation5 + $0x58] sm:$0xff] }
 0x430   :  { %v412_v13 = vmul.f32 %v1201_v14, %v411_v6 }
 0x436   :  { %845 = vmatmul.msk.f32.gmra.mxu2 %vm250_vm9, %v352_v50 }
 0x43e   :  { %846 = vmatmul.msk.f32.gmra.mxu2 %vm250_vm9, %v367_v58 }
 0x446   :  { %847 = vmatmul.msk.f32.gmra.mxu2 %vm250_vm9, %v382_v24 }
 0x44f   :  { %v313_v34 = vpop.xlane.xlu1 %312 }
 0x450   :  { %939 = vrcp.f32 %v313_v34  ;;  %v394_v8 = vand.u32 2147483648, %v313_v34  ;;  %v392_v45 = vand.u32 2147483647, %v313_v34  ;;  %vm388_vm14 = vweird.f32 %v313_v34 }
 0x451   :  { %941 = vrcp.f32 %v1237_v32 }
 0x452   :  { %v395_v47 = vor.u32 1.1754944e-38, %v394_v8  ;;  %vm393_vm2 = vcmp.eq.f32.partialorder %v392_v45, 8.507059e+37  ;;  %v568_v8 = vperm.slane %v1094_v36, 2 }
 0x456   :  { %v940_v35 = vpop.eup %939 }
 0x457   :  { %v942_v38 = vpop.eup %941  ;;  %v384_v39 = vmul.f32 %v940_v35, %v313_v34  ;;  %vm389_vm13 = vweird.f32 %v940_v35 }
 0x458   :  { %v414_v42 = vmul.f32 %v942_v38, %v1237_v32  ;;  %vm390_vm15 = vmor %vm388_vm14, %vm389_vm13  ;;  %vm419_vm7 = vweird.f32 %v942_v38 }
 0x459   :  { %v385_v40 = vsub.f32 1.0, %v384_v39  ;;  %vm420_vm14 = vmor %vm418_vm11, %vm419_vm7 }
 0x45a   :  { %v322_v43 = vpop.xlane.xlu0 %321  ;;  %v415_v48 = vsub.f32 1.0, %v414_v42 }
 0x45b   :  { %v386_v44 = vmul.f32 %v940_v35, %v385_v40  ;;  %943 = vrcp.f32 %v322_v43  ;;  %v439_v3 = vand.u32 2147483648, %v322_v43  ;;  %v437_v7 = vand.u32 2147483647, %v322_v43 }
 0x45c   :  { %v416_v60 = vmul.f32 %v942_v38, %v415_v48  ;;  %vm433_vm10 = vweird.f32 %v322_v43 }
 0x45d   :  { %v387_v46 = vadd.f32 %v940_v35, %v386_v44  ;;  %v440_v12 = vor.u32 1.1754944e-38, %v439_v3  ;;  %vm438_vm13 = vcmp.eq.f32.partialorder %v437_v7, 8.507059e+37  ;;  %v651_v3 = vld [vmem:[#allocation5 + $0x48] sm:$0xff] }
 0x45e   :  { %v417_v9 = vadd.f32 %v942_v38, %v416_v60 }
 0x45f   :  { %v391_v49 = vsel %vm390_vm15, %v940_v35, %v387_v46  ;;  %vm423_vm15 = vcmp.eq.f32.partialorder %v422_v15, 8.507059e+37 }
 0x460   :  { %v396_v53 = vsel %vm393_vm2, %v395_v47, %v391_v49  ;;  %v421_v50 = vsel %vm420_vm14, %v942_v38, %v417_v9  ;;  %vm561_vm2 = vcmask 195584  }
 0x461   :  { %v944_v56 = vpop.eup %943  ;;  %v397_v57 = vmul.f32 %v1213_v27, %v396_v53  ;;  %v426_v21 = vsel %vm423_vm15, %v425_v19, %v421_v50 }
 0x462   :  { %v429_v59 = vmul.f32 %v944_v56, %v322_v43  ;;  %vm434_vm6 = vweird.f32 %v944_v56  ;;  %v427_v22 = vmul.f32 %v1205_v17, %v426_v21  ;;  %v567_v17 = vld [vmem:[#allocation5 + $0x38] sm:$0xff]  ;;  %v644_v21 = vperm.slane %v1094_v36, 3 }
 0x463   :  { %848 = vmatmul.msk.f32.gmra.mxu2 %vm250_vm9, %v397_v57  ;;  %vm435_vm12 = vmor %vm433_vm10, %vm434_vm6  ;;  %587 = vmatpush.msrb.mxu3 %v567_v17 }
 0x464   :  { %v430_v1 = vsub.f32 1.0, %v429_v59 }
 0x465   :  { %588 = vmatpush.msrb.mxu3 %v566_v28 }
 0x466   :  { %v431_v5 = vmul.f32 %v944_v56, %v430_v1  ;;  %v652_v1 = vld [vmem:[#allocation5 + $0x50] sm:$0xff] }
 0x467   :  { %589 = vmatpush.msrb.mxu3 %v565_v29 }
 0x468   :  { %v432_v27 = vadd.f32 %v944_v56, %v431_v5  ;;  %v650_v5 = vld [vmem:[#allocation5 + $0x40] sm:$0xff] }
 0x469   :  { %590 = vmatpush.msrb.mxu3 %v564_v31 }
 0x46a   :  { %v436_v16 = vsel %vm435_vm12, %v944_v56, %v432_v27 }
 0x46b   :  { %849 = vmatmul.msk.f32.gmra.mxu2 %vm250_vm9, %v412_v13  ;;  %v441_v18 = vsel %vm438_vm13, %v440_v12, %v436_v16 }
 0x46c   :  { %v442_v20 = vmul.f32 %v1218_v30, %v441_v18 }
 0x46e   :  { %851 = vmatmul.msk.f32.vlgmr.msra.gmra.mxu3 %vm250_vm9, %v442_v20 }
 0x46f   :  { %673 = vmatpush.msra.mxu3 %v653_v63 }
 0x471   :  { %674 = vmatpush.msra.mxu3 %v652_v1 }
 0x473   :  { %850 = vmatmul.msk.f32.gmra.mxu2 %vm250_vm9, %v427_v22  ;;  %675 = vmatpush.msra.mxu3 %v651_v3 }
 0x475   :  { %676 = vmatpush.msra.mxu3 %v650_v5 }
 0x4b1   :  { %v508_v14 = vpop.f32.mrf.mxu2 }
 0x4b9   :  { %v511_v23 = vpop.f32.mrf.mxu2 }
 0x4c1   :  { %v514_v25 = vpop.f32.mrf.mxu2 }
 0x4c2   :  { %534 = vrot.lane.b32.xlu1 %v514_v25, %s1038_s18 }
 0x4c9   :  { %v517_v26 = vpop.f32.mrf.mxu2 }
 0x4ca   :  { %536 = vrot.lane.b32.xlu1 %v517_v26, %s1038_s18 }
 0x4e6   :  { %v520_v58 = vpop.f32.mrf.mxu2 }
 0x4e7   :  { %542 = vrot.lane.b32.xlu2 %v520_v58, %s1046_s24 }
 0x4ee   :  { %v523_v30 = vpop.f32.mrf.mxu2 }
 0x4f1   :  { %v529_v61 = vpop.f32.mrf.mxu3 }
 0x4f2   :  { %552 = vrot.lane.b32.xlu2 %v529_v61, %s1047_s25 }
 0x4f6   :  { %v526_v55 = vpop.f32.mrf.mxu2 }
 0x4f7   :  { %550 = vrot.lane.b32.xlu0 %v526_v55, %s1047_s25 }
 0x4ff   :  { %544 = vrot.lane.b32.xlu0 %v523_v30, %s1046_s24 }
 0x534   :  { %v535_v24 = vpop.permute.xlu1 %534 }
 0x535   :  { %v556_v33 = vsel %vm176_vm8, %v508_v14, %v535_v24  ;;  %v654_v24 = vperm.slane %v1094_v36, 5 }
 0x53c   :  { %v537_v37 = vpop.permute.xlu1 %536 }
 0x53d   :  { %v557_v38 = vsel %vm176_vm8, %v511_v23, %v537_v37 }
 0x541   :  { %v543_v32 = vpop.permute.xlu2 %542 }
 0x542   :  { %v559_v34 = vsel %vm558_vm1, %v556_v33, %v543_v32 }
 0x54c   :  { %v553_v40 = vpop.permute.xlu2 %552 }
 0x569   :  { %v551_v4 = vpop.permute.xlu0 %550 }
 0x56a   :  { %v562_v35 = vsel %vm561_vm2, %v559_v34, %v551_v4 }
 0x56b   :  { %852 = vmatmul.msk.f32.vlgmr.msrb.gmra.mxu3 %vm47_vm0, %v562_v35 }
 0x571   :  { %v545_v39 = vpop.permute.xlu0 %544 }
 0x572   :  { %v560_v41 = vsel %vm558_vm1, %v557_v38, %v545_v39 }
 0x573   :  { %v563_v42 = vsel %vm561_vm2, %v560_v41, %v553_v40  ;;  %v771_v40 = vld [vmem:[#allocation5 + $0x98] sm:$0xff] }
 0x574   :  { %853 = vmatmul.msk.f32.gmra.mxu3 %vm47_vm0, %v563_v42 }
 0x575   :  { %787 = vmatpush.msrb.mxu3 %v771_v40 }
 0x5ee   :  { %v592_v43 = vpop.f32.mrf.mxu3 }
 0x5ef   :  { %v593_v44 = vadd.f32 %v592_v43, %v568_v8 }
 0x5f1   :  { %v1260_v45 = vadd.f32 %v593_v44, %v1076_v0 }
 0x5f3   :  { %v600_v46 = vsel %vm47_vm0, %v1260_v45, 0.0 }
 0x5f4   :  { %601 = vadd.xlane.f32.xlu1 %v600_v46  ;;  %v768_v46 = vld [vmem:[#allocation5 + $0x80] sm:$0xff] }
 0x5f7   :  { %v595_v47 = vpop.f32.mrf.mxu3 }
 0x5f8   :  { %v596_v48 = vadd.f32 %v595_v47, %v568_v8  ;;  %v769_v8 = vld [vmem:[#allocation5 + $0x88] sm:$0xff] }
 0x5fa   :  { %v1265_v49 = vadd.f32 %v596_v48, %v1080_v2 }
 0x5fc   :  { %v603_v51 = vsel %vm47_vm0, %v1265_v49, 0.0 }
 0x5fd   :  { %604 = vadd.xlane.f32.xlu0 %v603_v51  ;;  %v767_v51 = vld [vmem:[#allocation5 + $0x78] sm:$0xff] }
 0x667   :  { %v602_v52 = vpop.xlane.xlu1 %601 }
 0x668   :  { %v606_v53 = vmul.f32 %v602_v52, %v1084_v10 }
 0x66a   :  { %v608_v56 = vsub.f32 %v1260_v45, %v606_v53 }
 0x66c   :  { %v610_v0 = vmul.f32 %v608_v56, %v608_v56 }
 0x66e   :  { %v612_v57 = vsel %vm47_vm0, %v610_v0, 0.0 }
 0x66f   :  { %613 = vadd.xlane.f32.xlu2 %v612_v57 }
 0x670   :  { %v605_v54 = vpop.xlane.xlu0 %604 }
 0x671   :  { %v607_v59 = vmul.f32 %v605_v54, %v1084_v10  ;;  %v765_v54 = vld [vmem:[#allocation5 + $0x68] sm:$0xff] }
 0x673   :  { %v609_v60 = vsub.f32 %v1265_v49, %v607_v59  ;;  %v764_v59 = vld [vmem:[#allocation5 + $0x60] sm:$0xff] }
 0x675   :  { %v611_v2 = vmul.f32 %v609_v60, %v609_v60 }
 0x677   :  { %v615_v62 = vsel %vm47_vm0, %v611_v2, 0.0 }
 0x678   :  { %616 = vadd.xlane.f32.xlu1 %v615_v62 }
 0x6e2   :  { %v614_v6 = vpop.xlane.xlu2 %613 }
 0x6e3   :  { %v618_v7 = vmul.f32 %v614_v6, %v1084_v10 }
 0x6e5   :  { %v620_v9 = vadd.f32 1e-05, %v618_v7 }
 0x6e7   :  { %945 = vrsqrt.f32 %v620_v9  ;;  %vm628_vm3 = vweird.f32 %v620_v9 }
 0x6eb   :  { %v617_v11 = vpop.xlane.xlu1 %616 }
 0x6ec   :  { %v619_v27 = vmul.f32 %v617_v11, %v1084_v10  ;;  %v647_v10 = vperm.slane %v1094_v36, 4  ;;  %v770_v36 = vld [vmem:[#allocation5 + $0x90] sm:$0xff] }
 0x6ed   :  { %v946_v12 = vpop.eup %945  ;;  %788 = vmatpush.msrb.mxu3 %v770_v36 }
 0x6ee   :  { %v623_v13 = vmul.f32 %v946_v12, %v620_v9  ;;  %v621_v15 = vadd.f32 1e-05, %v619_v27  ;;  %vm629_vm8 = vweird.f32 %v946_v12 }
 0x6ef   :  { %vm630_vm4 = vmor %vm628_vm3, %vm629_vm8  ;;  %789 = vmatpush.msrb.mxu3 %v769_v8 }
 0x6f0   :  { %v624_v16 = vmul.f32 %v946_v12, %v623_v13  ;;  %947 = vrsqrt.f32 %v621_v15  ;;  %vm638_vm6 = vweird.f32 %v621_v15 }
 0x6f1   :  { %790 = vmatpush.msrb.mxu3 %v768_v46 }
 0x6f2   :  { %v625_v18 = vmul.f32 0.5, %v624_v16 }
 0x6f3   :  { %791 = vmatpush.msrb.mxu3 %v767_v51 }
 0x6f4   :  { %v626_v50 = vsub.f32 1.5, %v625_v18 }
 0x6f6   :  { %v948_v19 = vpop.eup %947  ;;  %v627_v20 = vmul.f32 %v946_v12, %v626_v50 }
 0x6f7   :  { %v633_v22 = vmul.f32 %v948_v19, %v621_v15  ;;  %vm639_vm5 = vweird.f32 %v948_v19 }
 0x6f8   :  { %v631_v14 = vsel %vm630_vm4, %v946_v12, %v627_v20  ;;  %vm640_vm7 = vmor %vm638_vm6, %vm639_vm5 }
 0x6f9   :  { %v642_v23 = vmul.f32 %v631_v14, %v608_v56  ;;  %v634_v25 = vmul.f32 %v948_v19, %v633_v22  ;;  %v766_v56 = vld [vmem:[#allocation5 + $0x70] sm:$0xff] }
 0x6fa   :  { %792 = vmatpush.msrb.mxu3 %v766_v56  ;;  %v957_v56 = vld [vmem:[#allocation5 + $0xe0] sm:$0xff] }
 0x6fb   :  { %v645_v26 = vmul.f32 %v644_v21, %v642_v23  ;;  %v635_v58 = vmul.f32 0.5, %v634_v25 }
 0x6fc   :  { %793 = vmatpush.msrb.mxu3 %v765_v54 }
 0x6fd   :  { %v636_v30 = vsub.f32 1.5, %v635_v58  ;;  %v648_v61 = vadd.f32 %v647_v10, %v645_v26 }
 0x6fe   :  { %794 = vmatpush.msrb.mxu3 %v764_v59 }
 0x6ff   :  { %v637_v55 = vmul.f32 %v948_v19, %v636_v30  ;;  %854 = vmatmul.msk.f32.vlgmr.msra.gmra.mxu3 %vm47_vm0, %v648_v61 }
 0x701   :  { %v641_v17 = vsel %vm640_vm7, %v948_v19, %v637_v55 }
 0x702   :  { %v643_v28 = vmul.f32 %v641_v17, %v609_v60 }
 0x704   :  { %v646_v29 = vmul.f32 %v644_v21, %v643_v28 }
 0x706   :  { %v649_v31 = vadd.f32 %v647_v10, %v646_v29 }
 0x708   :  { %855 = vmatmul.msk.f32.gmra.mxu3 %vm47_vm0, %v649_v31 }
 0x782   :  { %v678_v32 = vpop.f32.mrf.mxu3 }
 0x783   :  { %v1282_v33 = vadd.f32 %v678_v32, %v654_v24 }
 0x785   :  { %v1285_v34 = vmul.f32 0.70710677, %v1282_v33  ;;  %v684_v36 = vmul.f32 0.5, %v1282_v33  ;;  %v772_v33 = vperm.slane %v957_v56, 6 }
 0x787   :  { %v688_v4 = vand.u32 2147483647, %v1285_v34  ;;  %vm754_vm8 = vcmp.ge.f32.partialorder %v1285_v34, 0.0 }
 0x789   :  { %v690_v35 = vmul.f32 0.3275911, %v688_v4  ;;  %v742_v3 = vsub.f32 0.0, %v688_v4 }
 0x78b   :  { %v692_v37 = vadd.f32 1.0, %v690_v35  ;;  %v681_v38 = vpop.f32.mrf.mxu3  ;;  %v744_v27 = vmul.f32 %v742_v3, %v688_v4 }
 0x78c   :  { %v1288_v39 = vadd.f32 %v681_v38, %v654_v24 }
 0x78d   :  { %949 = vrcp.f32 %v692_v37  ;;  %v705_v53 = vand.u32 2147483648, %v692_v37  ;;  %v703_v57 = vand.u32 2147483647, %v692_v37  ;;  %vm699_vm11 = vweird.f32 %v692_v37 }
 0x78e   :  { %v1291_v41 = vmul.f32 0.70710677, %v1288_v39  ;;  %v746_v19 = vmul.f32 1.442695, %v744_v27 }
 0x78f   :  { %v706_v2 = vor.u32 1.1754944e-38, %v705_v53  ;;  %vm704_vm13 = vcmp.eq.f32.partialorder %v703_v57, 8.507059e+37 }
 0x790   :  { %v689_v42 = vand.u32 2147483647, %v1291_v41  ;;  %vm755_vm3 = vcmp.ge.f32.partialorder %v1291_v41, 0.0 }
 0x792   :  { %v691_v43 = vmul.f32 0.3275911, %v689_v42  ;;  %v743_v22 = vsub.f32 0.0, %v689_v42 }
 0x793   :  { %v950_v44 = vpop.eup %949 }
 0x794   :  { %v695_v47 = vmul.f32 %v950_v44, %v692_v37  ;;  %v693_v48 = vadd.f32 1.0, %v691_v43  ;;  %vm700_vm10 = vweird.f32 %v950_v44  ;;  %v745_v58 = vmul.f32 %v743_v22, %v689_v42 }
 0x795   :  { %vm701_vm12 = vmor %vm699_vm11, %vm700_vm10 }
 0x796   :  { %v696_v52 = vsub.f32 1.0, %v695_v47  ;;  %951 = vrcp.f32 %v693_v48  ;;  %v720_v11 = vand.u32 2147483648, %v693_v48  ;;  %v718_v13 = vand.u32 2147483647, %v693_v48 }
 0x797   :  { %vm714_vm15 = vweird.f32 %v693_v48  ;;  %953 = vpow2.f32 %v746_v19  ;;  %v748_v28 = vmul.f32 1.442695, %v745_v58 }
 0x798   :  { %v697_v0 = vmul.f32 %v950_v44, %v696_v52  ;;  %v721_v50 = vor.u32 1.1754944e-38, %v720_v11  ;;  %vm719_vm2 = vcmp.eq.f32.partialorder %v718_v13, 8.507059e+37  ;;  %v685_v52 = vmul.f32 0.5, %v1288_v39 }
 0x799   :  { %955 = vpow2.f32 %v748_v28 }
 0x79a   :  { %v698_v60 = vadd.f32 %v950_v44, %v697_v0 }
 0x79c   :  { %v952_v62 = vpop.eup %951  ;;  %v702_v63 = vsel %vm701_vm12, %v950_v44, %v698_v60 }
 0x79d   :  { %v707_v1 = vsel %vm704_vm13, %v706_v2, %v702_v63  ;;  %v710_v5 = vmul.f32 %v952_v62, %v693_v48  ;;  %vm715_vm14 = vweird.f32 %v952_v62  ;;  %v954_v29 = vpop.eup %953 }
 0x79e   :  { %v724_v6 = vmul.f32 1.0614054, %v707_v1  ;;  %vm716_vm1 = vmor %vm714_vm15, %vm715_vm14 }
 0x79f   :  { %v711_v7 = vsub.f32 1.0, %v710_v5  ;;  %v956_v43 = vpop.eup %955 }
 0x7a0   :  { %v726_v9 = vadd.f32 -1.4531521, %v724_v6 }
 0x7a1   :  { %v712_v12 = vmul.f32 %v952_v62, %v711_v7 }
 0x7a2   :  { %v728_v15 = vmul.f32 %v726_v9, %v707_v1 }
 0x7a3   :  { %v713_v16 = vadd.f32 %v952_v62, %v712_v12 }
 0x7a4   :  { %v730_v18 = vadd.f32 1.4214138, %v728_v15 }
 0x7a5   :  { %v717_v20 = vsel %vm716_vm1, %v952_v62, %v713_v16 }
 0x7a6   :  { %v732_v21 = vmul.f32 %v730_v18, %v707_v1  ;;  %v722_v14 = vsel %vm719_vm2, %v721_v50, %v717_v20 }
 0x7a7   :  { %v725_v23 = vmul.f32 1.0614054, %v722_v14 }
 0x7a8   :  { %v734_v25 = vadd.f32 -0.28449672, %v732_v21 }
 0x7a9   :  { %v727_v10 = vadd.f32 -1.4531521, %v725_v23 }
 0x7aa   :  { %v736_v26 = vmul.f32 %v734_v25, %v707_v1 }
 0x7ab   :  { %v729_v30 = vmul.f32 %v727_v10, %v722_v14 }
 0x7ac   :  { %v738_v61 = vadd.f32 0.2548296, %v736_v26 }
 0x7ad   :  { %v731_v55 = vadd.f32 1.4214138, %v729_v30 }
 0x7ae   :  { %v740_v17 = vmul.f32 %v738_v61, %v707_v1 }
 0x7af   :  { %v733_v31 = vmul.f32 %v731_v55, %v722_v14 }
 0x7b0   :  { %v750_v24 = vmul.f32 %v954_v29, %v740_v17 }
 0x7b1   :  { %v735_v32 = vadd.f32 -0.28449672, %v733_v31 }
 0x7b2   :  { %v752_v4 = vsub.f32 1.0, %v750_v24 }
 0x7b3   :  { %v737_v35 = vmul.f32 %v735_v32, %v722_v14 }
 0x7b4   :  { %v756_v37 = vsub.f32 0.0, %v752_v4 }
 0x7b5   :  { %v739_v38 = vadd.f32 0.2548296, %v737_v35 }
 0x7b6   :  { %v758_v40 = vsel %vm754_vm8, %v752_v4, %v756_v37 }
 0x7b7   :  { %v760_v42 = vadd.f32 1.0, %v758_v40  ;;  %v741_v8 = vmul.f32 %v739_v38, %v722_v14 }
 0x7b9   :  { %v762_v44 = vmul.f32 %v760_v42, %v684_v36  ;;  %v751_v46 = vmul.f32 %v956_v43, %v741_v8 }
 0x7bb   :  { %856 = vmatmul.msk.f32.vlgmr.msrb.gmra.mxu3 %vm250_vm9, %v762_v44  ;;  %v753_v47 = vsub.f32 1.0, %v751_v46 }
 0x7bd   :  { %v757_v48 = vsub.f32 0.0, %v753_v47 }
 0x7bf   :  { %v759_v51 = vsel %vm755_vm3, %v753_v47, %v757_v48 }
 0x7c0   :  { %v761_v53 = vadd.f32 1.0, %v759_v51 }
 0x7c2   :  { %v763_v34 = vmul.f32 %v761_v53, %v685_v52 }
 0x7c4   :  { %857 = vmatmul.msk.f32.gmra.mxu3 %vm250_vm9, %v763_v34 }
 0x83e   :  { %v796_v0 = vpop.f32.mrf.mxu3 }
 0x83f   :  { %v797_v57 = vadd.f32 %v796_v0, %v772_v33 }
 0x841   :  { %v802_v54 = vadd.f32 %v797_v57, %v1260_v45 }
 0x843   :  { %804 = vst.msk [vmem:[#allocation7] sm:$0xff] %vm47_vm0, %v802_v54 }
 0x847   :  { %v799_v59 = vpop.f32.mrf.mxu3 }
 0x848   :  { %v800_v39 = vadd.f32 %v799_v59, %v772_v33 }
 0x84a   :  { %v803_v41 = vadd.f32 %v800_v39, %v1265_v49 }
 0x84c   :  { %805 = vst.msk [vmem:[#allocation7 + $0x8] sm:$0xff] %vm47_vm0, %v803_v41 }
 0x84d   :  { %818 = dma.vmem_to_hbm [thread:$0]  %s811_s27, 256, %s813_s30, [#allocation4], %s1037_s17, %s1037_s17, %s1038_s18  }
 0x84e   :  { %1034 = dma.done.wait [#allocation4], 256  }
 0x84f   :  { %1035 = vsyncadd [#allocation4], 4294967040 }
 0x850   :  { %823 = vsyncpa [#allocation3], 1 }
 0x851   :  { %824 = vsyncpa [#allocation6], 1 }
 0x852   :  { %825 = vsyncpa [#allocation4], 1 }

</bundles_post_ra>
